<compile_context>
chip_gen: v7x
topology: tpu7x:2x2x1
jax: 0.10.0
libtpu: 0.0.40
codegen_flags: <defaults>
</compile_context>

<pallas_src>
import jax
import jax.numpy as jnp
import numpy as np
from jax.experimental import pallas as pl
from jax.experimental.pallas import tpu as pltpu

EMB_DIM = 32
NUM_LAYERS = 3
NUM_ATOM_TYPE = 120
NUM_CHIRALITY = 3
NUM_BOND_TYPE = 6          # bond type 4 == self-loop, as in deepchem GINConv
NUM_BOND_DIR = 3
BOND_PAD = 8               # pad tiny bond-type/dir axes to 8 sublanes
BN_EPS = 1e-5
JUMP_KNOWLEDGE = "concat"  # matches docstring example: out dim = (L+1)*emb_dim


# ----------------------------------------------------------------------------
# Fused Pallas kernel: all GIN layers + jump-knowledge concat in one call.
#   per layer l:
#     agg = A @ h + Ct @ e1[l] + Cd @ e2[l]        (message passing, scatter-add)
#     h   = ReLU( ReLU(agg @ w1[l] + b1[l]) @ w2'[l] + b2'[l] )   (BN folded)
#   output: concat([h0, h1, ..., hL], axis=1)  -> lane-dense (N, 128) store
# ----------------------------------------------------------------------------
def fused_gnn_kernel(x_ref, a_ref, ct_ref, cd_ref,
                     e1_ref, e2_ref, w1_ref, b1_ref, w2_ref, b2_ref,
                     o_ref):
    h = x_ref[...]
    a = a_ref[...]
    ct = ct_ref[...]
    cd = cd_ref[...]
    outs = [h]
    for l in range(NUM_LAYERS):           # static unroll (NUM_LAYERS = 3)
        eagg = (jnp.dot(ct, e1_ref[l], preferred_element_type=jnp.float32) +
                jnp.dot(cd, e2_ref[l], preferred_element_type=jnp.float32))
        agg = jnp.dot(a, h, preferred_element_type=jnp.float32) + eagg
        h1 = jnp.maximum(
            jnp.dot(agg, w1_ref[l], preferred_element_type=jnp.float32) + b1_ref[l],
            0.0)
        h = jnp.maximum(
            jnp.dot(h1, w2_ref[l], preferred_element_type=jnp.float32) + b2_ref[l],
            0.0)
        outs.append(h)
    # Single unmasked full-lane-width store of the JK-concat representation.
    o_ref[...] = jnp.concatenate(outs, axis=1)


def _full_spec(shape):
    nd = len(shape)
    return pl.BlockSpec(shape, lambda i, _nd=nd: (0,) * _nd)


def gnn_fused(x0, adj, ct, cd, e1, e2, w1, b1, w2, b2):
    n, d = x0.shape
    out_d = (NUM_LAYERS + 1) * d
    args = (x0, adj, ct, cd, e1, e2, w1, b1, w2, b2)
    return pl.pallas_call(
        fused_gnn_kernel,
        grid=(1,),
        in_specs=[_full_spec(a.shape) for a in args],
        out_specs=_full_spec((n, out_d)),
        out_shape=jax.ShapeDtypeStruct((n, out_d), jnp.float32),
        compiler_params=pltpu.CompilerParams(
            dimension_semantics=("arbitrary",)),
    )(*args)


# ----------------------------------------------------------------------------
# Deterministic parameter construction (synthetic; shapes as in GNNModular/GIN)
# ----------------------------------------------------------------------------
def init_params(key):
    ks = jax.random.split(key, 2 + NUM_LAYERS)
    params = {
        "atom_emb": 0.5 * jax.random.normal(ks[0], (NUM_ATOM_TYPE, EMB_DIM), jnp.float32),
        "chir_emb": 0.5 * jax.random.normal(ks[1], (NUM_CHIRALITY, EMB_DIM), jnp.float32),
        "layers": [],
    }
    d, d2 = EMB_DIM, 2 * EMB_DIM
    for i in range(NUM_LAYERS):
        lk = jax.random.split(ks[2 + i], 10)
        params["layers"].append({
            "edge_emb1": 0.5 * jax.random.normal(lk[0], (NUM_BOND_TYPE, d), jnp.float32),
            "edge_emb2": 0.5 * jax.random.normal(lk[1], (NUM_BOND_DIR, d), jnp.float32),
            "w1": jax.random.normal(lk[2], (d, d2), jnp.float32) / np.sqrt(d),
            "b1": 0.1 * jax.random.normal(lk[3], (d2,), jnp.float32),
            "w2": jax.random.normal(lk[4], (d2, d), jnp.float32) / np.sqrt(d2),
            "b2": 0.1 * jax.random.normal(lk[5], (d,), jnp.float32),
            "bn_gamma": 1.0 + 0.1 * jax.random.normal(lk[6], (d,), jnp.float32),
            "bn_beta": 0.1 * jax.random.normal(lk[7], (d,), jnp.float32),
            "bn_mean": 0.1 * jax.random.normal(lk[8], (d,), jnp.float32),
            "bn_var": 1.0 + 0.1 * jnp.abs(jax.random.normal(lk[9], (d,), jnp.float32)),
        })
    return params


def _prep_graph(edge_index, edge_features, n):
    """Add self-loops (bond type 4, dir 0) like deepchem GINConv, then build
    dense count matrices: adjacency A (N,N), bond-type counts Ct (N,8),
    bond-dir counts Cd (N,8).  These collapse gather + scatter-add into matmuls."""
    ar = jnp.arange(n, dtype=edge_index.dtype)
    src = jnp.concatenate([edge_index[0], ar])
    dst = jnp.concatenate([edge_index[1], ar])
    e_type = jnp.concatenate(
        [edge_features[:, 0], jnp.full((n,), 4, dtype=edge_features.dtype)])
    e_dir = jnp.concatenate(
        [edge_features[:, 1], jnp.zeros((n,), dtype=edge_features.dtype)])
    adj = jnp.zeros((n, n), jnp.float32).at[dst, src].add(1.0)
    ct = jnp.zeros((n, BOND_PAD), jnp.float32).at[dst, e_type].add(1.0)
    cd = jnp.zeros((n, BOND_PAD), jnp.float32).at[dst, e_dir].add(1.0)
    return src, dst, e_type, e_dir, adj, ct, cd


def _pack_layer_params(layers):
    """Stack per-layer params and fold eval-mode BatchNorm into w2/b2."""
    e1 = jnp.stack([jnp.pad(lp["edge_emb1"],
                            ((0, BOND_PAD - NUM_BOND_TYPE), (0, 0)))
                    for lp in layers])                       # (L, 8, D)
    e2 = jnp.stack([jnp.pad(lp["edge_emb2"],
                            ((0, BOND_PAD - NUM_BOND_DIR), (0, 0)))
                    for lp in layers])                       # (L, 8, D)
    w1 = jnp.stack([lp["w1"] for lp in layers])              # (L, D, 2D)
    b1 = jnp.stack([lp["b1"][None, :] for lp in layers])     # (L, 1, 2D)
    w2f, b2f = [], []
    for lp in layers:
        scale = lp["bn_gamma"] / jnp.sqrt(lp["bn_var"] + BN_EPS)
        w2f.append(lp["w2"] * scale[None, :])
        b2f.append(((lp["b2"] - lp["bn_mean"]) * scale + lp["bn_beta"])[None, :])
    return e1, e2, w1, b1, jnp.stack(w2f), jnp.stack(b2f)    # w2' (L,2D,D), b2' (L,1,D)


def gnn_forward(params, node_features, edge_index, edge_features):
    n = node_features.shape[0]
    # node embeddings: atom-type + chirality (host-side gather glue, runs once)
    x = (params["atom_emb"][node_features[:, 0]] +
         params["chir_emb"][node_features[:, 1]]).astype(jnp.float32)
    _, _, _, _, adj, ct, cd = _prep_graph(edge_index, edge_features, n)
    e1, e2, w1, b1, w2, b2 = _pack_layer_params(params["layers"])
    out = gnn_fused(x, adj, ct, cd, e1, e2, w1, b1, w2, b2)   # (N, (L+1)*D)

    if JUMP_KNOWLEDGE == "concat":
        return out
    hs = out.reshape(n, NUM_LAYERS + 1, EMB_DIM)
    if JUMP_KNOWLEDGE == "last":
        return hs[:, -1, :]
    elif JUMP_KNOWLEDGE == "max":
        return jnp.max(hs, axis=1)
    elif JUMP_KNOWLEDGE == "sum":
        return jnp.sum(hs, axis=1)
    raise ValueError(JUMP_KNOWLEDGE)


# Pure-JAX reference (segment_sum based) for correctness checking.
def reference_forward(params, node_features, edge_index, edge_features):
    n = node_features.shape[0]
    x = (params["atom_emb"][node_features[:, 0]] +
         params["chir_emb"][node_features[:, 1]]).astype(jnp.float32)
    src, dst, e_type, e_dir, _, _, _ = _prep_graph(edge_index, edge_features, n)
    h_list = [x]
    h = x
    for lp in params["layers"]:
        eemb = lp["edge_emb1"][e_type] + lp["edge_emb2"][e_dir]
        msgs = h[src] + eemb
        agg = jax.ops.segment_sum(msgs, dst, num_segments=n)
        h1 = jnp.maximum(agg @ lp["w1"] + lp["b1"], 0.0)
        h2 = h1 @ lp["w2"] + lp["b2"]
        hbn = (h2 - lp["bn_mean"]) / jnp.sqrt(lp["bn_var"] + BN_EPS) \
              * lp["bn_gamma"] + lp["bn_beta"]
        h = jnp.maximum(hbn, 0.0)
        h_list.append(h)
    return jnp.concatenate(h_list, axis=1)


if __name__ == "__main__":
    key = jax.random.PRNGKey(0)
    kp, kn, kc, ke, ka, kb = jax.random.split(key, 6)
    params = init_params(kp)

    N, E = 23, 50  # small molecule-sized graph (like docstring example)
    node_features = jnp.stack([
        jax.random.randint(kn, (N,), 0, NUM_ATOM_TYPE),
        jax.random.randint(kc, (N,), 0, NUM_CHIRALITY),
    ], axis=1).astype(jnp.int32)                       # (N, 2)
    edge_index = jax.random.randint(ke, (2, E), 0, N).astype(jnp.int32)  # (2, E)
    edge_features = jnp.stack([
        jax.random.randint(ka, (E,), 0, 4),            # bond types 0..3 (4 = self-loop)
        jax.random.randint(kb, (E,), 0, NUM_BOND_DIR),
    ], axis=1).astype(jnp.int32)                       # (E, 2)

    out = gnn_forward(params, node_features, edge_index, edge_features)
    out = jax.block_until_ready(out)

    assert out.shape == (N, EMB_DIM * (NUM_LAYERS + 1)), out.shape
    ref = reference_forward(params, node_features, edge_index, edge_features)
    np.testing.assert_allclose(np.asarray(out), np.asarray(ref),
                               rtol=1e-2, atol=1e-2)
    print("KERNEL_OK")
</pallas_src>

<mosaic_0001>
module attributes {stable_mosaic.version = 11 : i64} {
  func.func @fused_gnn_kernel(%arg0: i32, %arg1: memref<23x32xf32, #tpu.memory_space<vmem>>, %arg2: memref<23x23xf32, #tpu.memory_space<vmem>>, %arg3: memref<23x8xf32, #tpu.memory_space<vmem>>, %arg4: memref<23x8xf32, #tpu.memory_space<vmem>>, %arg5: memref<3x8x32xf32, #tpu.memory_space<vmem>>, %arg6: memref<3x8x32xf32, #tpu.memory_space<vmem>>, %arg7: memref<3x32x64xf32, #tpu.memory_space<vmem>>, %arg8: memref<3x1x64xf32, #tpu.memory_space<vmem>>, %arg9: memref<3x64x32xf32, #tpu.memory_space<vmem>>, %arg10: memref<3x1x32xf32, #tpu.memory_space<vmem>>, %arg11: memref<23x128xf32, #tpu.memory_space<vmem>>) attributes {dimension_semantics = [#tpu.dimension_semantics<arbitrary>], iteration_bounds = array<i64: 1>, scalar_prefetch = 0 : i64, scratch_operands = 0 : i64, tpu.core_type = #tpu.core_type<tc>, window_params = [{pipeline_mode = #tpu.pipeline_mode<synchronous>, transform_indices = @transform_0, window_bounds = array<i64: 23, 32>}, {pipeline_mode = #tpu.pipeline_mode<synchronous>, transform_indices = @transform_1, window_bounds = array<i64: 23, 23>}, {pipeline_mode = #tpu.pipeline_mode<synchronous>, transform_indices = @transform_2, window_bounds = array<i64: 23, 8>}, {pipeline_mode = #tpu.pipeline_mode<synchronous>, transform_indices = @transform_3, window_bounds = array<i64: 23, 8>}, {pipeline_mode = #tpu.pipeline_mode<synchronous>, transform_indices = @transform_4, window_bounds = array<i64: 3, 8, 32>}, {pipeline_mode = #tpu.pipeline_mode<synchronous>, transform_indices = @transform_5, window_bounds = array<i64: 3, 8, 32>}, {pipeline_mode = #tpu.pipeline_mode<synchronous>, transform_indices = @transform_6, window_bounds = array<i64: 3, 32, 64>}, {pipeline_mode = #tpu.pipeline_mode<synchronous>, transform_indices = @transform_7, window_bounds = array<i64: 3, 1, 64>}, {pipeline_mode = #tpu.pipeline_mode<synchronous>, transform_indices = @transform_8, window_bounds = array<i64: 3, 64, 32>}, {pipeline_mode = #tpu.pipeline_mode<synchronous>, transform_indices = @transform_9, window_bounds = array<i64: 3, 1, 32>}, {pipeline_mode = #tpu.pipeline_mode<synchronous>, transform_indices = @transform_10, window_bounds = array<i64: 23, 128>}]} {
    %c0 = arith.constant 0 : index
    %c0_0 = arith.constant 0 : index
    %0 = vector.load %arg1[%c0, %c0_0] : memref<23x32xf32, #tpu.memory_space<vmem>>, vector<23x32xf32>
    %c0_1 = arith.constant 0 : index
    %c0_2 = arith.constant 0 : index
    %1 = vector.load %arg2[%c0_1, %c0_2] : memref<23x23xf32, #tpu.memory_space<vmem>>, vector<23x23xf32>
    %c0_3 = arith.constant 0 : index
    %c0_4 = arith.constant 0 : index
    %2 = vector.load %arg3[%c0_3, %c0_4] : memref<23x8xf32, #tpu.memory_space<vmem>>, vector<23x8xf32>
    %c0_5 = arith.constant 0 : index
    %c0_6 = arith.constant 0 : index
    %3 = vector.load %arg4[%c0_5, %c0_6] : memref<23x8xf32, #tpu.memory_space<vmem>>, vector<23x8xf32>
    %c0_7 = arith.constant 0 : index
    %c0_8 = arith.constant 0 : index
    %c0_9 = arith.constant 0 : index
    %4 = vector.load %arg5[%c0_7, %c0_8, %c0_9] : memref<3x8x32xf32, #tpu.memory_space<vmem>>, vector<1x8x32xf32>
    %5 = vector.shape_cast %4 : vector<1x8x32xf32> to vector<8x32xf32>
    %cst = arith.constant dense<0.000000e+00> : vector<23x32xf32>
    %6 = tpu.matmul %2, %5, %cst {dimension_numbers = #tpu.dot_dimension_numbers<[1], [0], [0], [1], [0, 0, 1, 1], [], []>} : vector<23x8xf32>, vector<8x32xf32>, vector<23x32xf32> -> vector<23x32xf32>
    %c0_10 = arith.constant 0 : index
    %c0_11 = arith.constant 0 : index
    %c0_12 = arith.constant 0 : index
    %7 = vector.load %arg6[%c0_10, %c0_11, %c0_12] : memref<3x8x32xf32, #tpu.memory_space<vmem>>, vector<1x8x32xf32>
    %8 = vector.shape_cast %7 : vector<1x8x32xf32> to vector<8x32xf32>
    %cst_13 = arith.constant dense<0.000000e+00> : vector<23x32xf32>
    %9 = tpu.matmul %3, %8, %cst_13 {dimension_numbers = #tpu.dot_dimension_numbers<[1], [0], [0], [1], [0, 0, 1, 1], [], []>} : vector<23x8xf32>, vector<8x32xf32>, vector<23x32xf32> -> vector<23x32xf32>
    %10 = arith.addf %6, %9 : vector<23x32xf32>
    %cst_14 = arith.constant dense<0.000000e+00> : vector<23x32xf32>
    %11 = tpu.matmul %1, %0, %cst_14 {dimension_numbers = #tpu.dot_dimension_numbers<[1], [0], [0], [1], [0, 0, 1, 1], [], []>} : vector<23x23xf32>, vector<23x32xf32>, vector<23x32xf32> -> vector<23x32xf32>
    %12 = arith.addf %11, %10 : vector<23x32xf32>
    %c0_15 = arith.constant 0 : index
    %c0_16 = arith.constant 0 : index
    %c0_17 = arith.constant 0 : index
    %13 = vector.load %arg7[%c0_15, %c0_16, %c0_17] : memref<3x32x64xf32, #tpu.memory_space<vmem>>, vector<1x32x64xf32>
    %14 = vector.shape_cast %13 : vector<1x32x64xf32> to vector<32x64xf32>
    %cst_18 = arith.constant dense<0.000000e+00> : vector<23x64xf32>
    %15 = tpu.matmul %12, %14, %cst_18 {dimension_numbers = #tpu.dot_dimension_numbers<[1], [0], [0], [1], [0, 0, 1, 1], [], []>} : vector<23x32xf32>, vector<32x64xf32>, vector<23x64xf32> -> vector<23x64xf32>
    %c0_19 = arith.constant 0 : index
    %c0_20 = arith.constant 0 : index
    %c0_21 = arith.constant 0 : index
    %16 = vector.load %arg8[%c0_19, %c0_20, %c0_21] : memref<3x1x64xf32, #tpu.memory_space<vmem>>, vector<1x1x64xf32>
    %17 = vector.shape_cast %16 : vector<1x1x64xf32> to vector<1x64xf32>
    %18 = vector.broadcast %17 : vector<1x64xf32> to vector<23x64xf32>
    %19 = arith.addf %15, %18 : vector<23x64xf32>
    %cst_22 = arith.constant 0.000000e+00 : f32
    %20 = vector.broadcast %cst_22 : f32 to vector<23x64xf32>
    %21 = arith.maximumf %19, %20 : vector<23x64xf32>
    %c0_23 = arith.constant 0 : index
    %c0_24 = arith.constant 0 : index
    %c0_25 = arith.constant 0 : index
    %22 = vector.load %arg9[%c0_23, %c0_24, %c0_25] : memref<3x64x32xf32, #tpu.memory_space<vmem>>, vector<1x64x32xf32>
    %23 = vector.shape_cast %22 : vector<1x64x32xf32> to vector<64x32xf32>
    %cst_26 = arith.constant dense<0.000000e+00> : vector<23x32xf32>
    %24 = tpu.matmul %21, %23, %cst_26 {dimension_numbers = #tpu.dot_dimension_numbers<[1], [0], [0], [1], [0, 0, 1, 1], [], []>} : vector<23x64xf32>, vector<64x32xf32>, vector<23x32xf32> -> vector<23x32xf32>
    %c0_27 = arith.constant 0 : index
    %c0_28 = arith.constant 0 : index
    %c0_29 = arith.constant 0 : index
    %25 = vector.load %arg10[%c0_27, %c0_28, %c0_29] : memref<3x1x32xf32, #tpu.memory_space<vmem>>, vector<1x1x32xf32>
    %26 = vector.shape_cast %25 : vector<1x1x32xf32> to vector<1x32xf32>
    %27 = vector.broadcast %26 : vector<1x32xf32> to vector<23x32xf32>
    %28 = arith.addf %24, %27 : vector<23x32xf32>
    %cst_30 = arith.constant 0.000000e+00 : f32
    %29 = vector.broadcast %cst_30 : f32 to vector<23x32xf32>
    %30 = arith.maximumf %28, %29 : vector<23x32xf32>
    %c1 = arith.constant 1 : index
    %c0_31 = arith.constant 0 : index
    %c0_32 = arith.constant 0 : index
    %31 = vector.load %arg5[%c1, %c0_31, %c0_32] : memref<3x8x32xf32, #tpu.memory_space<vmem>>, vector<1x8x32xf32>
    %32 = vector.shape_cast %31 : vector<1x8x32xf32> to vector<8x32xf32>
    %cst_33 = arith.constant dense<0.000000e+00> : vector<23x32xf32>
    %33 = tpu.matmul %2, %32, %cst_33 {dimension_numbers = #tpu.dot_dimension_numbers<[1], [0], [0], [1], [0, 0, 1, 1], [], []>} : vector<23x8xf32>, vector<8x32xf32>, vector<23x32xf32> -> vector<23x32xf32>
    %c1_34 = arith.constant 1 : index
    %c0_35 = arith.constant 0 : index
    %c0_36 = arith.constant 0 : index
    %34 = vector.load %arg6[%c1_34, %c0_35, %c0_36] : memref<3x8x32xf32, #tpu.memory_space<vmem>>, vector<1x8x32xf32>
    %35 = vector.shape_cast %34 : vector<1x8x32xf32> to vector<8x32xf32>
    %cst_37 = arith.constant dense<0.000000e+00> : vector<23x32xf32>
    %36 = tpu.matmul %3, %35, %cst_37 {dimension_numbers = #tpu.dot_dimension_numbers<[1], [0], [0], [1], [0, 0, 1, 1], [], []>} : vector<23x8xf32>, vector<8x32xf32>, vector<23x32xf32> -> vector<23x32xf32>
    %37 = arith.addf %33, %36 : vector<23x32xf32>
    %cst_38 = arith.constant dense<0.000000e+00> : vector<23x32xf32>
    %38 = tpu.matmul %1, %30, %cst_38 {dimension_numbers = #tpu.dot_dimension_numbers<[1], [0], [0], [1], [0, 0, 1, 1], [], []>} : vector<23x23xf32>, vector<23x32xf32>, vector<23x32xf32> -> vector<23x32xf32>
    %39 = arith.addf %38, %37 : vector<23x32xf32>
    %c1_39 = arith.constant 1 : index
    %c0_40 = arith.constant 0 : index
    %c0_41 = arith.constant 0 : index
    %40 = vector.load %arg7[%c1_39, %c0_40, %c0_41] : memref<3x32x64xf32, #tpu.memory_space<vmem>>, vector<1x32x64xf32>
    %41 = vector.shape_cast %40 : vector<1x32x64xf32> to vector<32x64xf32>
    %cst_42 = arith.constant dense<0.000000e+00> : vector<23x64xf32>
    %42 = tpu.matmul %39, %41, %cst_42 {dimension_numbers = #tpu.dot_dimension_numbers<[1], [0], [0], [1], [0, 0, 1, 1], [], []>} : vector<23x32xf32>, vector<32x64xf32>, vector<23x64xf32> -> vector<23x64xf32>
    %c1_43 = arith.constant 1 : index
    %c0_44 = arith.constant 0 : index
    %c0_45 = arith.constant 0 : index
    %43 = vector.load %arg8[%c1_43, %c0_44, %c0_45] : memref<3x1x64xf32, #tpu.memory_space<vmem>>, vector<1x1x64xf32>
    %44 = vector.shape_cast %43 : vector<1x1x64xf32> to vector<1x64xf32>
    %45 = vector.broadcast %44 : vector<1x64xf32> to vector<23x64xf32>
    %46 = arith.addf %42, %45 : vector<23x64xf32>
    %cst_46 = arith.constant 0.000000e+00 : f32
    %47 = vector.broadcast %cst_46 : f32 to vector<23x64xf32>
    %48 = arith.maximumf %46, %47 : vector<23x64xf32>
    %c1_47 = arith.constant 1 : index
    %c0_48 = arith.constant 0 : index
    %c0_49 = arith.constant 0 : index
    %49 = vector.load %arg9[%c1_47, %c0_48, %c0_49] : memref<3x64x32xf32, #tpu.memory_space<vmem>>, vector<1x64x32xf32>
    %50 = vector.shape_cast %49 : vector<1x64x32xf32> to vector<64x32xf32>
    %cst_50 = arith.constant dense<0.000000e+00> : vector<23x32xf32>
    %51 = tpu.matmul %48, %50, %cst_50 {dimension_numbers = #tpu.dot_dimension_numbers<[1], [0], [0], [1], [0, 0, 1, 1], [], []>} : vector<23x64xf32>, vector<64x32xf32>, vector<23x32xf32> -> vector<23x32xf32>
    %c1_51 = arith.constant 1 : index
    %c0_52 = arith.constant 0 : index
    %c0_53 = arith.constant 0 : index
    %52 = vector.load %arg10[%c1_51, %c0_52, %c0_53] : memref<3x1x32xf32, #tpu.memory_space<vmem>>, vector<1x1x32xf32>
    %53 = vector.shape_cast %52 : vector<1x1x32xf32> to vector<1x32xf32>
    %54 = vector.broadcast %53 : vector<1x32xf32> to vector<23x32xf32>
    %55 = arith.addf %51, %54 : vector<23x32xf32>
    %cst_54 = arith.constant 0.000000e+00 : f32
    %56 = vector.broadcast %cst_54 : f32 to vector<23x32xf32>
    %57 = arith.maximumf %55, %56 : vector<23x32xf32>
    %c2 = arith.constant 2 : index
    %c0_55 = arith.constant 0 : index
    %c0_56 = arith.constant 0 : index
    %58 = vector.load %arg5[%c2, %c0_55, %c0_56] : memref<3x8x32xf32, #tpu.memory_space<vmem>>, vector<1x8x32xf32>
    %59 = vector.shape_cast %58 : vector<1x8x32xf32> to vector<8x32xf32>
    %cst_57 = arith.constant dense<0.000000e+00> : vector<23x32xf32>
    %60 = tpu.matmul %2, %59, %cst_57 {dimension_numbers = #tpu.dot_dimension_numbers<[1], [0], [0], [1], [0, 0, 1, 1], [], []>} : vector<23x8xf32>, vector<8x32xf32>, vector<23x32xf32> -> vector<23x32xf32>
    %c2_58 = arith.constant 2 : index
    %c0_59 = arith.constant 0 : index
    %c0_60 = arith.constant 0 : index
    %61 = vector.load %arg6[%c2_58, %c0_59, %c0_60] : memref<3x8x32xf32, #tpu.memory_space<vmem>>, vector<1x8x32xf32>
    %62 = vector.shape_cast %61 : vector<1x8x32xf32> to vector<8x32xf32>
    %cst_61 = arith.constant dense<0.000000e+00> : vector<23x32xf32>
    %63 = tpu.matmul %3, %62, %cst_61 {dimension_numbers = #tpu.dot_dimension_numbers<[1], [0], [0], [1], [0, 0, 1, 1], [], []>} : vector<23x8xf32>, vector<8x32xf32>, vector<23x32xf32> -> vector<23x32xf32>
    %64 = arith.addf %60, %63 : vector<23x32xf32>
    %cst_62 = arith.constant dense<0.000000e+00> : vector<23x32xf32>
    %65 = tpu.matmul %1, %57, %cst_62 {dimension_numbers = #tpu.dot_dimension_numbers<[1], [0], [0], [1], [0, 0, 1, 1], [], []>} : vector<23x23xf32>, vector<23x32xf32>, vector<23x32xf32> -> vector<23x32xf32>
    %66 = arith.addf %65, %64 : vector<23x32xf32>
    %c2_63 = arith.constant 2 : index
    %c0_64 = arith.constant 0 : index
    %c0_65 = arith.constant 0 : index
    %67 = vector.load %arg7[%c2_63, %c0_64, %c0_65] : memref<3x32x64xf32, #tpu.memory_space<vmem>>, vector<1x32x64xf32>
    %68 = vector.shape_cast %67 : vector<1x32x64xf32> to vector<32x64xf32>
    %cst_66 = arith.constant dense<0.000000e+00> : vector<23x64xf32>
    %69 = tpu.matmul %66, %68, %cst_66 {dimension_numbers = #tpu.dot_dimension_numbers<[1], [0], [0], [1], [0, 0, 1, 1], [], []>} : vector<23x32xf32>, vector<32x64xf32>, vector<23x64xf32> -> vector<23x64xf32>
    %c2_67 = arith.constant 2 : index
    %c0_68 = arith.constant 0 : index
    %c0_69 = arith.constant 0 : index
    %70 = vector.load %arg8[%c2_67, %c0_68, %c0_69] : memref<3x1x64xf32, #tpu.memory_space<vmem>>, vector<1x1x64xf32>
    %71 = vector.shape_cast %70 : vector<1x1x64xf32> to vector<1x64xf32>
    %72 = vector.broadcast %71 : vector<1x64xf32> to vector<23x64xf32>
    %73 = arith.addf %69, %72 : vector<23x64xf32>
    %cst_70 = arith.constant 0.000000e+00 : f32
    %74 = vector.broadcast %cst_70 : f32 to vector<23x64xf32>
    %75 = arith.maximumf %73, %74 : vector<23x64xf32>
    %c2_71 = arith.constant 2 : index
    %c0_72 = arith.constant 0 : index
    %c0_73 = arith.constant 0 : index
    %76 = vector.load %arg9[%c2_71, %c0_72, %c0_73] : memref<3x64x32xf32, #tpu.memory_space<vmem>>, vector<1x64x32xf32>
    %77 = vector.shape_cast %76 : vector<1x64x32xf32> to vector<64x32xf32>
    %cst_74 = arith.constant dense<0.000000e+00> : vector<23x32xf32>
    %78 = tpu.matmul %75, %77, %cst_74 {dimension_numbers = #tpu.dot_dimension_numbers<[1], [0], [0], [1], [0, 0, 1, 1], [], []>} : vector<23x64xf32>, vector<64x32xf32>, vector<23x32xf32> -> vector<23x32xf32>
    %c2_75 = arith.constant 2 : index
    %c0_76 = arith.constant 0 : index
    %c0_77 = arith.constant 0 : index
    %79 = vector.load %arg10[%c2_75, %c0_76, %c0_77] : memref<3x1x32xf32, #tpu.memory_space<vmem>>, vector<1x1x32xf32>
    %80 = vector.shape_cast %79 : vector<1x1x32xf32> to vector<1x32xf32>
    %81 = vector.broadcast %80 : vector<1x32xf32> to vector<23x32xf32>
    %82 = arith.addf %78, %81 : vector<23x32xf32>
    %cst_78 = arith.constant 0.000000e+00 : f32
    %83 = vector.broadcast %cst_78 : f32 to vector<23x32xf32>
    %84 = arith.maximumf %82, %83 : vector<23x32xf32>
    %85 = tpu.concatenate %0, %30, %57, %84 in 1 : vector<23x32xf32>, vector<23x32xf32>, vector<23x32xf32>, vector<23x32xf32> -> vector<23x128xf32>
    %c0_79 = arith.constant 0 : index
    %c0_80 = arith.constant 0 : index
    %86 = vector.load %arg11[%c0_79, %c0_80] : memref<23x128xf32, #tpu.memory_space<vmem>>, vector<23x128xf32>
    tpu.vector_store %arg11[%c0_79, %c0_80], %85 {strides = array<i32>} : memref<23x128xf32, #tpu.memory_space<vmem>>, vector<23x128xf32>,
    return
  }
  func.func @transform_0(%arg0: i32) -> (i32, i32) {
    %c0_i32 = arith.constant 0 : i32
    %c0_i32_0 = arith.constant 0 : i32
    %c0_i32_1 = arith.constant 0 : i32
    return %c0_i32, %c0_i32_0 : i32, i32
  }
  func.func @transform_1(%arg0: i32) -> (i32, i32) {
    %c0_i32 = arith.constant 0 : i32
    %c0_i32_0 = arith.constant 0 : i32
    %c0_i32_1 = arith.constant 0 : i32
    return %c0_i32, %c0_i32_0 : i32, i32
  }
  func.func @transform_2(%arg0: i32) -> (i32, i32) {
    %c0_i32 = arith.constant 0 : i32
    %c0_i32_0 = arith.constant 0 : i32
    %c0_i32_1 = arith.constant 0 : i32
    return %c0_i32, %c0_i32_0 : i32, i32
  }
  func.func @transform_3(%arg0: i32) -> (i32, i32) {
    %c0_i32 = arith.constant 0 : i32
    %c0_i32_0 = arith.constant 0 : i32
    %c0_i32_1 = arith.constant 0 : i32
    return %c0_i32, %c0_i32_0 : i32, i32
  }
  func.func @transform_4(%arg0: i32) -> (i32, i32, i32) {
    %c0_i32 = arith.constant 0 : i32
    %c0_i32_0 = arith.constant 0 : i32
    %c0_i32_1 = arith.constant 0 : i32
    %c0_i32_2 = arith.constant 0 : i32
    return %c0_i32, %c0_i32_0, %c0_i32_1 : i32, i32, i32
  }
  func.func @transform_5(%arg0: i32) -> (i32, i32, i32) {
    %c0_i32 = arith.constant 0 : i32
    %c0_i32_0 = arith.constant 0 : i32
    %c0_i32_1 = arith.constant 0 : i32
    %c0_i32_2 = arith.constant 0 : i32
    return %c0_i32, %c0_i32_0, %c0_i32_1 : i32, i32, i32
  }
  func.func @transform_6(%arg0: i32) -> (i32, i32, i32) {
    %c0_i32 = arith.constant 0 : i32
    %c0_i32_0 = arith.constant 0 : i32
    %c0_i32_1 = arith.constant 0 : i32
    %c0_i32_2 = arith.constant 0 : i32
    return %c0_i32, %c0_i32_0, %c0_i32_1 : i32, i32, i32
  }
  func.func @transform_7(%arg0: i32) -> (i32, i32, i32) {
    %c0_i32 = arith.constant 0 : i32
    %c0_i32_0 = arith.constant 0 : i32
    %c0_i32_1 = arith.constant 0 : i32
    %c0_i32_2 = arith.constant 0 : i32
    return %c0_i32, %c0_i32_0, %c0_i32_1 : i32, i32, i32
  }
  func.func @transform_8(%arg0: i32) -> (i32, i32, i32) {
    %c0_i32 = arith.constant 0 : i32
    %c0_i32_0 = arith.constant 0 : i32
    %c0_i32_1 = arith.constant 0 : i32
    %c0_i32_2 = arith.constant 0 : i32
    return %c0_i32, %c0_i32_0, %c0_i32_1 : i32, i32, i32
  }
  func.func @transform_9(%arg0: i32) -> (i32, i32, i32) {
    %c0_i32 = arith.constant 0 : i32
    %c0_i32_0 = arith.constant 0 : i32
    %c0_i32_1 = arith.constant 0 : i32
    %c0_i32_2 = arith.constant 0 : i32
    return %c0_i32, %c0_i32_0, %c0_i32_1 : i32, i32, i32
  }
  func.func @transform_10(%arg0: i32) -> (i32, i32) {
    %c0_i32 = arith.constant 0 : i32
    %c0_i32_0 = arith.constant 0 : i32
    %c0_i32_1 = arith.constant 0 : i32
    return %c0_i32, %c0_i32_0 : i32, i32
  }
}

</mosaic_0001>

<bundles_post_ra>
// kernel: tpu_custom_call.1
= control target key start
LH: loop header
LB: loop body
LE: loop exit
PB: predicated region body
PF: predicated region fallthrough
CT: control target
= control target key end

     0   :  { %vm50_vm0 = vcmask 64512   ;;  %v2071_v2 = vmov 0.0   ;;  %vm2072_vm1 = vmmov 0   ;;  %v2073_v4 = vmov 0.0|0.0   ;;  %s2561_s0 = inlined_call_operand.vmem [shape: f32[23,32], index: 0, kind: input, shape index: {}]   ;;  %s2562_s1 = inlined_call_operand.vmem [shape: f32[23,23], index: 1, kind: input, shape index: {}]   ;;  %s2563_s2 = inlined_call_operand.vmem [shape: f32[23,8], index: 2, kind: input, shape index: {}]   ;;  %s2564_s3 = inlined_call_operand.vmem [shape: f32[23,8], index: 3, kind: input, shape index: {}]   ;;  %s2565_s4 = inlined_call_operand.vmem [shape: f32[3,8,32], index: 4, kind: input, shape index: {}]   ;;  %s2566_s5 = inlined_call_operand.vmem [shape: f32[3,8,32], index: 5, kind: input, shape index: {}]   ;;  %s2567_s6 = inlined_call_operand.vmem [shape: f32[3,32,64], index: 6, kind: input, shape index: {}]   ;;  %s2568_s7 = inlined_call_operand.vmem [shape: f32[3,1,64], index: 7, kind: input, shape index: {}]   ;;  %s2569_s8 = inlined_call_operand.vmem [shape: f32[3,64,32], index: 8, kind: input, shape index: {}]   ;;  %s2570_s9 = inlined_call_operand.vmem [shape: f32[3,1,32], index: 9, kind: input, shape index: {}]   ;;  %s2571_s10 = inlined_call_operand.hbm [shape: f32[23,128], index: 10, kind: output, shape index: {}]  }
   0x1   :  { %v49_v0 = vld [vmem:[%s2566_s5] sm:$0xff]  ;;  %1702 = vmatprep.subr.mxu0 %v2071_v2  ;;  %1704 = vmatprep.mubr.msk.f32.mxu0 %vm2072_vm1, %v2071_v2  ;;  %v2158_v5 = vld [vmem:[%s2564_s3 + $0x8] sm:$0xff]  ;;  %v325_v8 = vld [vmem:[%s2567_s6 + $0x10] sm:$0xff] }
   0x2   :  { %v2141_v1 = vld [vmem:[%s2564_s3] sm:$0xff]  ;;  %1703 = vmatpush3.msra.mxu0 %v49_v0  ;;  %1942 = vmatprep.subr.bf16.mxu1 %v2073_v4  ;;  %v324_v7 = vld [vmem:[%s2567_s6 + $0x8] sm:$0xff]  ;;  %v326_v9 = vld [vmem:[%s2567_s6 + $0x18] sm:$0xff] }
   0x3   :  { %v48_v3 = vld [vmem:[%s2565_s4] sm:$0xff]  ;;  %1705 = vmatmul.mubr.msk.f32.vlgmr.msra.gmra.mrb[0].mxu0 %vm50_vm0, %v2141_v1  ;;  %1713 = vmatprep.subr.mxu0 %v2071_v2 }
   0x4   :  { %1707 = vmatprep.mubr.msk.f32.mxu0 %vm2072_vm1, %v2071_v2  ;;  %1714 = vmatpush3.msra.mxu0 %v48_v3  ;;  %v323_v6 = vld [vmem:[%s2567_s6] sm:$0xff] }
   0x5   :  { %1939 = vmatprep.subr.bf16.mxu0 %v2073_v4  ;;  %1747 = vmatprep.mubr.msk.f32.mxu1 %vm2072_vm1, %v2071_v2  ;;  %v1943_v10 = vpack.c.bf16 %v324_v7, %v323_v6 }
   0x6   :  { %15 = vsyncpa [#allocation3], 0  ;;  %v2182_v11 = vld [vmem:[%s2564_s3 + $0x10] sm:$0x7f]  ;;  %v1946_v12 = vpack.c.bf16 %v326_v9, %v325_v8  ;;  %v2187_v13 = vld [vmem:[%s2561_s0] sm:$0xff]  ;;  %vm239_vm2 = vcmask 1046528  }
   0x7   :  { %1708 = vmatmul.mubr.msk.f32.gmra.mrb[2].mxu0 %vm50_vm0, %v2158_v5  ;;  %1944 = vmatpush3.bf16.msra.mxu1 %v1943_v10  ;;  %v2192_v14 = vld [vmem:[%s2561_s0 + $0x8] sm:$0xff]  ;;  %v2202_v15 = vld [vmem:[%s2563_s2] sm:$0xff]  ;;  %v2220_v18 = vld [vmem:[%s2561_s0 + $0x10] sm:$0x7f]  ;;  %vm229_vm3 = vcmask 187392   ;;  %vm334_vm4 = vcmask 261120  }
   0x8   :  { %1710 = vmatprep.mubr.msk.f32.mxu0 %vm2072_vm1, %v2071_v2  ;;  %1945 = vmatprep.subr.bf16.mxu1 %v2073_v4  ;;  %v1940_v16 = vpack.c.bf16 %v2192_v14, %v2187_v13  ;;  %v2214_v17 = vld [vmem:[%s2563_s2 + $0x8] sm:$0xff]  ;;  %v2229_v19 = vld [vmem:[%s2563_s2 + $0x10] sm:$0x7f]  ;;  %v2241_v20 = vld [vmem:[%s2562_s1] sm:$0xff]  ;;  %vm442_vm5 = vcmask 523264   ;;  %s2074_s13 = smov 32  }
   0x9   :  { %v2250_v21 = vld [vmem:[%s2562_s1 + $0x8] sm:$0xff]  ;;  %v2259_v22 = vld [vmem:[%s2562_s1 + $0x10] sm:$0x7f]  ;;  %v427_v23 = vld [vmem:[%s2569_s8] sm:$0xff]  ;;  %s2075_s19 = smov 64   ;;  %s2076_s12 = smov 96  }
   0xa   :  { %v428_v24 = vld [vmem:[%s2569_s8 + $0x8] sm:$0xff]  ;;  %v429_v26 = vld [vmem:[%s2569_s8 + $0x10] sm:$0xff]  ;;  %v430_v27 = vld [vmem:[%s2569_s8 + $0x18] sm:$0xff]  ;;  %vm1497_vm6 = vcmask 785408  }
   0xb   :  { %1711 = vmatmul.mubr.msk.f32.gmra.mrb[4].mxu0 %vm50_vm0, %v2182_v11  ;;  %1947 = vmatpush3.bf16.msra.mxu1 %v1946_v12  ;;  %v1949_v25 = vpack.c.bf16 %v428_v24, %v427_v23  ;;  %v1952_v30 = vpack.c.bf16 %v430_v27, %v429_v26  ;;  %v431_v31 = vld [vmem:[%s2569_s8 + $0x20] sm:$0xff]  ;;  %v432_v32 = vld [vmem:[%s2569_s8 + $0x28] sm:$0xff]  ;;  %v433_v38 = vld [vmem:[%s2569_s8 + $0x30] sm:$0xff] }
   0xc   :  { %1715 = vmatprep.mubr.msk.f32.mxu0 %vm2072_vm1, %v2071_v2  ;;  %1948 = vmatprep.subr.bf16.mxu1 %v2073_v4  ;;  %v1955_v35 = vpack.c.bf16 %v432_v32, %v431_v31  ;;  %v434_v39 = vld [vmem:[%s2569_s8 + $0x38] sm:$0xff]  ;;  %v1530_v41 = vld [vmem:[%s2568_s7] ss:$0 sm:$0xff]  ;;  %v1539_v46 = vld [vmem:[%s2566_s5 + $0x8] sm:$0xff] }
   0xd   :  { %v1958_v40 = vpack.c.bf16 %v434_v39, %v433_v38  ;;  %v1538_v55 = vld [vmem:[%s2565_s4 + $0x8] sm:$0xff]  ;;  %v1534_v56 = vld [vmem:[%s2570_s9] ss:$0 sm:$0xff]  ;;  %v1552_v60 = vld [vmem:[%s2567_s6 + $0x30] sm:$0xff] }
   0xe   :  { %v1550_v58 = vld [vmem:[%s2567_s6 + $0x20] sm:$0xff]  ;;  %v1551_v59 = vld [vmem:[%s2567_s6 + $0x28] sm:$0xff]  ;;  %v1553_v0 = vld [vmem:[%s2567_s6 + $0x38] sm:$0xff] }
   0xf   :  { %1716 = vmatmul.mubr.msk.f32.vlgmr.msra.gmra.mrb[0].mxu0 %vm50_vm0, %v2202_v15  ;;  %v1964_v63 = vpack.c.bf16 %v1551_v59, %v1550_v58  ;;  %v1967_v6 = vpack.c.bf16 %v1553_v0, %v1552_v60  ;;  %v1559_v26 = vld [vmem:[%s2569_s8 + $0x40] sm:$0xff]  ;;  %v1560_v27 = vld [vmem:[%s2569_s8 + $0x48] sm:$0xff]  ;;  %v1572_v58 = vld [vmem:[%s2565_s4 + $0x10] sm:$0xff] }
  0x10   :  { %1718 = vmatprep.mubr.msk.f32.mxu0 %vm2072_vm1, %v2071_v2  ;;  %1941 = vmatpush3.bf16.msra.mxu0 %v1940_v16 }
  0x11   :  { %1728 = vmatprep.subr.mxu0 %v2071_v2 }
  0x13   :  { %1719 = vmatmul.mubr.msk.f32.gmra.mrb[2].mxu0 %vm50_vm0, %v2214_v17 }
  0x14   :  { %1721 = vmatprep.mubr.msk.f32.mxu0 %vm2072_vm1, %v2071_v2  ;;  %1729 = vmatpush3.msk.msra.mxu0 %vm239_vm2, %v2220_v18 }
  0x15   :  { %1963 = vmatprep.subr.bf16.mxu0 %v2073_v4 }
  0x17   :  { %1722 = vmatmul.mubr.msk.f32.gmra.mrb[4].mxu0 %vm50_vm0, %v2229_v19 }
  0x18   :  { %1730 = vmatprep.mubr.msk.f32.mxu0 %vm2072_vm1, %v2071_v2 }
  0x1b   :  { %1731 = vmatmul.mubr.msk.f32.vlgmr.msra.gmra.mrb[0].mxu0 %vm229_vm3, %v2241_v20 }
  0x1c   :  { %1733 = vmatprep.mubr.msk.f32.mxu0 %vm2072_vm1, %v2071_v2  ;;  %1965 = vmatpush3.bf16.msra.mxu0 %v1964_v63 }
  0x1d   :  { %1966 = vmatprep.subr.bf16.mxu0 %v2073_v4 }
  0x1f   :  { %1734 = vmatmul.mubr.msk.f32.gmra.mrb[2].mxu0 %vm229_vm3, %v2250_v21 }
  0x20   :  { %1736 = vmatprep.mubr.msk.f32.mxu0 %vm2072_vm1, %v2071_v2  ;;  %1968 = vmatpush3.bf16.msra.mxu0 %v1967_v6 }
  0x21   :  { %1969 = vmatprep.subr.bf16.mxu0 %v2073_v4 }
  0x23   :  { %1737 = vmatmul.mubr.msk.f32.gmra.mrb[4].mxu0 %vm229_vm3, %v2259_v22 }
  0x24   :  { %1826 = vmatprep.mubr.msk.f32.mxu0 %vm2072_vm1, %v2071_v2 }
  0xee   :  { %v309_v28 = vpop.f32.mrb[0].mxu0 }
  0xef   :  { %v1732_v29 = vpop.f32.mrb[1].mxu0  ;;  %1748 = vmatmul.mubr.msk.f32.vlgmr.msra.gmra.mrb[0].mxu1 %vm334_vm4, %v309_v28  ;;  %v1970_v28 = vpack.c.bf16 %v1560_v27, %v1559_v26 }
  0xf0   :  { %1750 = vmatprep.mubr.msk.f32.mxu1 %vm2072_vm1, %v2071_v2  ;;  %1950 = vmatpush3.bf16.msra.mxu1 %v1949_v25  ;;  %v1561_v29 = vld [vmem:[%s2569_s8 + $0x50] sm:$0xff] }
  0xf1   :  { %1951 = vmatprep.subr.bf16.mxu1 %v2073_v4 }
  0xf2   :  { %v314_v33 = vpop.f32.mrb[2].mxu0 }
  0xf3   :  { %v1735_v34 = vpop.f32.mrb[3].mxu0  ;;  %1751 = vmatmul.mubr.msk.f32.gmra.mrb[2].mxu1 %vm334_vm4, %v314_v33 }
  0xf4   :  { %1753 = vmatprep.mubr.msk.f32.mxu1 %vm2072_vm1, %v2071_v2  ;;  %1953 = vmatpush3.bf16.msra.mxu1 %v1952_v30  ;;  %v1562_v30 = vld [vmem:[%s2569_s8 + $0x58] sm:$0xff]  ;;  %v1563_v34 = vld [vmem:[%s2569_s8 + $0x60] sm:$0xff] }
  0xf5   :  { %1954 = vmatprep.subr.bf16.mxu1 %v2073_v4  ;;  %v1973_v33 = vpack.c.bf16 %v1562_v30, %v1561_v29  ;;  %v1598_v29 = vld [vmem:[%s2569_s8 + $0xa8] sm:$0xff] }
  0xf6   :  { %v319_v36 = vpop.f32.mrb[4].mxu0 }
  0xf7   :  { %v1738_v37 = vpop.f32.mrb[5].mxu0  ;;  %1754 = vmatmul.mubr.msk.f32.gmra.mrb[4].mxu1 %vm334_vm4, %v319_v36 }
  0xf8   :  { %1956 = vmatpush3.bf16.msra.mxu1 %v1955_v35  ;;  %1772 = vmatprep.mubr.msk.f32.mxu1 %vm2072_vm1, %v2071_v2  ;;  %v1564_v35 = vld [vmem:[%s2569_s8 + $0x68] sm:$0xff] }
  0xf9   :  { %1957 = vmatprep.subr.bf16.mxu1 %v2073_v4  ;;  %v1976_v38 = vpack.c.bf16 %v1564_v35, %v1563_v34  ;;  %v1599_v35 = vld [vmem:[%s2569_s8 + $0xb0] sm:$0xff] }
  0xfc   :  { %1959 = vmatpush3.bf16.msra.mxu1 %v1958_v40 }
  0xfd   :  { %1781 = vmatprep.subr.mxu1 %v2071_v2 }
 0x1c2   :  { %v410_v42 = vpop.f32.mrb[0].mxu1 }
 0x1c3   :  { %v411_v43 = vadd.f32 %v1530_v41, %v410_v42  ;;  %v1749_v44 = vpop.f32.mrb[1].mxu1  ;;  %v1566_v42 = vld [vmem:[%s2569_s8 + $0x78] sm:$0xff] }
 0x1c4   :  { %v1555_v44 = vld [vmem:[%s2568_s7 + $0x1] ss:$0 sm:$0xff] }
 0x1c5   :  { %v424_v45 = vmax.f32 %v411_v43, 0.0 }
 0x1c6   :  { %v415_v47 = vpop.f32.mrb[2].mxu1 }
 0x1c7   :  { %v416_v48 = vadd.f32 %v1530_v41, %v415_v47  ;;  %v1752_v49 = vpop.f32.mrb[3].mxu1  ;;  %1773 = vmatmul.mubr.msk.f32.vlgmr.msra.gmra.mrb[6].mxu1 %vm442_vm5, %v424_v45 }
 0x1c8   :  { %1775 = vmatprep.mubr.msk.f32.mxu1 %vm2072_vm1, %v2071_v2  ;;  %1782 = vmatpush3.msra.mxu1 %v1539_v46  ;;  %v1573_v49 = vld [vmem:[%s2566_s5 + $0x10] sm:$0xff] }
 0x1c9   :  { %v425_v50 = vmax.f32 %v416_v48, 0.0  ;;  %1792 = vmatprep.subr.mxu1 %v2071_v2 }
 0x1ca   :  { %v420_v51 = vpop.f32.mrb[4].mxu1 }
 0x1cb   :  { %v421_v52 = vadd.f32 %v1530_v41, %v420_v51  ;;  %v1755_v53 = vpop.f32.mrb[5].mxu1  ;;  %1776 = vmatmul.mubr.msk.f32.gmra.mrb[8].mxu1 %vm442_vm5, %v425_v50  ;;  %v1565_v41 = vld [vmem:[%s2569_s8 + $0x70] sm:$0xff] }
 0x1cc   :  { %1778 = vmatprep.mubr.msk.f32.mxu1 %vm2072_vm1, %v2071_v2  ;;  %v1979_v43 = vpack.c.bf16 %v1566_v42, %v1565_v41 }
 0x1cd   :  { %v426_v54 = vmax.f32 %v421_v52, 0.0 }
 0x1cf   :  { %1779 = vmatmul.mubr.msk.f32.gmra.mrb[10].mxu1 %vm442_vm5, %v426_v54 }
 0x1d0   :  { %1783 = vmatprep.mubr.msk.f32.mxu1 %vm2072_vm1, %v2071_v2 }
 0x1d3   :  { %1784 = vmatmul.mubr.msk.f32.vlgmr.msra.gmra.mrb[12].mxu1 %vm50_vm0, %v2141_v1 }
 0x1d4   :  { %1786 = vmatprep.mubr.msk.f32.mxu1 %vm2072_vm1, %v2071_v2  ;;  %1793 = vmatpush3.msra.mxu1 %v1538_v55 }
 0x1d5   :  { %1960 = vmatprep.subr.bf16.mxu1 %v2073_v4 }
 0x1d7   :  { %1787 = vmatmul.mubr.msk.f32.gmra.mrb[14].mxu1 %vm50_vm0, %v2158_v5 }
 0x1d8   :  { %1789 = vmatprep.mubr.msk.f32.mxu1 %vm2072_vm1, %v2071_v2 }
 0x1db   :  { %1790 = vmatmul.mubr.msk.f32.gmra.mrb[16].mxu1 %vm50_vm0, %v2182_v11 }
 0x1dc   :  { %1794 = vmatprep.mubr.msk.f32.mxu1 %vm2072_vm1, %v2071_v2 }
 0x1df   :  { %1795 = vmatmul.mubr.msk.f32.vlgmr.msra.gmra.mrb[12].mxu1 %vm50_vm0, %v2202_v15 }
 0x1e0   :  { %1797 = vmatprep.mubr.msk.f32.mxu1 %vm2072_vm1, %v2071_v2 }
 0x1e3   :  { %1798 = vmatmul.mubr.msk.f32.gmra.mrb[14].mxu1 %vm50_vm0, %v2214_v17 }
 0x1e4   :  { %1800 = vmatprep.mubr.msk.f32.mxu1 %vm2072_vm1, %v2071_v2 }
 0x1e7   :  { %1801 = vmatmul.mubr.msk.f32.gmra.mrb[16].mxu1 %vm50_vm0, %v2229_v19 }
 0x1e8   :  { %1809 = vmatprep.mubr.msk.f32.mxu1 %vm2072_vm1, %v2071_v2 }
 0x29a   :  { %v518_v57 = vpop.f32.mrb[6].mxu1 }
 0x29b   :  { %v519_v61 = vadd.f32 %v1534_v56, %v518_v57  ;;  %v1774_v62 = vpop.f32.mrb[7].mxu1 }
 0x29d   :  { %v532_v3 = vmax.f32 %v519_v61, 0.0  ;;  %v1587_v61 = vld [vmem:[%s2567_s6 + $0x58] sm:$0xff] }
 0x29e   :  { %v523_v7 = vpop.f32.mrb[8].mxu1 }
 0x29f   :  { %v524_v8 = vadd.f32 %v1534_v56, %v523_v7  ;;  %1459 = vrot.lane.b32.xlu0 %v532_v3, %s2074_s13  ;;  %v1777_v9 = vpop.f32.mrb[9].mxu1 }
 0x2a1   :  { %v533_v10 = vmax.f32 %v524_v8, 0.0 }
 0x2a2   :  { %v528_v12 = vpop.f32.mrb[10].mxu1 }
 0x2a3   :  { %v1961_v16 = vpack.c.bf16 %v533_v10, %v532_v3  ;;  %v529_v23 = vadd.f32 %v1534_v56, %v528_v12  ;;  %1461 = vrot.lane.b32.xlu0 %v533_v10, %s2074_s13  ;;  %v1780_v24 = vpop.f32.mrb[11].mxu1 }
 0x2a5   :  { %v534_v25 = vmax.f32 %v529_v23, 0.0  ;;  %1962 = vmatpush3.bf16.msra.mxu1 %v1961_v16  ;;  %v1593_v23 = vld [vmem:[%s2569_s8 + $0x80] sm:$0xff] }
 0x2a6   :  { %1807 = vmatprep.subr.mxu1 %v2071_v2 }
 0x2a7   :  { %1463 = vrot.lane.b32.xlu1 %v534_v25, %s2074_s13 }
 0x2a9   :  { %1808 = vmatpush3.msk.msra.mxu1 %vm239_vm2, %v534_v25  ;;  %v1595_v25 = vld [vmem:[%s2569_s8 + $0x90] sm:$0xff] }
 0x2aa   :  { %1810 = vmatmul.mubr.msk.f32.vlgmr.msra.gmra.mrb[12].mxu1 %vm229_vm3, %v2241_v20  ;;  %1984 = vmatprep.subr.bf16.mxu1 %v2073_v4 }
 0x2ab   :  { %1812 = vmatprep.mubr.msk.f32.mxu1 %vm2072_vm1, %v2071_v2 }
 0x2ae   :  { %1813 = vmatmul.mubr.msk.f32.gmra.mrb[14].mxu1 %vm229_vm3, %v2250_v21 }
 0x2af   :  { %1815 = vmatprep.mubr.msk.f32.mxu1 %vm2072_vm1, %v2071_v2 }
 0x2b2   :  { %1816 = vmatmul.mubr.msk.f32.gmra.mrb[16].mxu1 %vm229_vm3, %v2259_v22 }
 0x2b3   :  { %1905 = vmatprep.mubr.msk.f32.mxu1 %vm2072_vm1, %v2071_v2 }
 0x37d   :  { %v768_v31 = vpop.f32.mrb[12].mxu1 }
 0x37e   :  { %v1811_v32 = vpop.f32.mrb[13].mxu1  ;;  %1827 = vmatmul.mubr.msk.f32.vlgmr.msra.gmra.mrb[6].mxu0 %vm334_vm4, %v768_v31 }
 0x37f   :  { %1829 = vmatprep.mubr.msk.f32.mxu0 %vm2072_vm1, %v2071_v2  ;;  %1971 = vmatpush3.bf16.msra.mxu0 %v1970_v28  ;;  %v1597_v28 = vld [vmem:[%s2569_s8 + $0xa0] sm:$0xff] }
 0x380   :  { %1972 = vmatprep.subr.bf16.mxu0 %v2073_v4  ;;  %v1997_v32 = vpack.c.bf16 %v1598_v29, %v1597_v28 }
 0x381   :  { %v773_v36 = vpop.f32.mrb[14].mxu1 }
 0x382   :  { %v1814_v37 = vpop.f32.mrb[15].mxu1  ;;  %1830 = vmatmul.mubr.msk.f32.gmra.mrb[8].mxu0 %vm334_vm4, %v773_v36  ;;  %v1600_v36 = vld [vmem:[%s2569_s8 + $0xb8] sm:$0xff] }
 0x383   :  { %1832 = vmatprep.mubr.msk.f32.mxu0 %vm2072_vm1, %v2071_v2  ;;  %1974 = vmatpush3.bf16.msra.mxu0 %v1973_v33  ;;  %v2000_v37 = vpack.c.bf16 %v1600_v36, %v1599_v35 }
 0x384   :  { %1975 = vmatprep.subr.bf16.mxu0 %v2073_v4 }
 0x385   :  { %v778_v39 = vpop.f32.mrb[16].mxu1 }
 0x386   :  { %v1817_v40 = vpop.f32.mrb[17].mxu1  ;;  %1833 = vmatmul.mubr.msk.f32.gmra.mrb[10].mxu0 %vm334_vm4, %v778_v39 }
 0x387   :  { %1977 = vmatpush3.bf16.msra.mxu0 %v1976_v38  ;;  %1851 = vmatprep.mubr.msk.f32.mxu0 %vm2072_vm1, %v2071_v2  ;;  %v1589_v38 = vld [vmem:[%s2568_s7 + $0x2] ss:$0 sm:$0xff] }
 0x388   :  { %1978 = vmatprep.subr.bf16.mxu0 %v2073_v4 }
 0x38b   :  { %1980 = vmatpush3.bf16.msra.mxu0 %v1979_v43 }
 0x38c   :  { %1860 = vmatprep.subr.mxu0 %v2071_v2 }
 0x451   :  { %v870_v45 = vpop.f32.mrb[6].mxu0 }
 0x452   :  { %v871_v46 = vadd.f32 %v1555_v44, %v870_v45  ;;  %v1828_v47 = vpop.f32.mrb[7].mxu0 }
 0x454   :  { %v884_v48 = vmax.f32 %v871_v46, 0.0 }
 0x455   :  { %v875_v50 = vpop.f32.mrb[8].mxu0 }
 0x456   :  { %v876_v51 = vadd.f32 %v1555_v44, %v875_v50  ;;  %v1831_v52 = vpop.f32.mrb[9].mxu0  ;;  %1852 = vmatmul.mubr.msk.f32.vlgmr.msra.gmra.mrb[12].mxu0 %vm442_vm5, %v884_v48  ;;  %v1602_v50 = vld [vmem:[%s2570_s9 + $0x2] ss:$0 sm:$0xff] }
 0x457   :  { %1854 = vmatprep.mubr.msk.f32.mxu0 %vm2072_vm1, %v2071_v2  ;;  %1861 = vmatpush3.msra.mxu0 %v1573_v49 }
 0x458   :  { %v885_v53 = vmax.f32 %v876_v51, 0.0  ;;  %1871 = vmatprep.subr.mxu0 %v2071_v2 }
 0x459   :  { %v880_v54 = vpop.f32.mrb[10].mxu0 }
 0x45a   :  { %v881_v55 = vadd.f32 %v1555_v44, %v880_v54  ;;  %v1834_v56 = vpop.f32.mrb[11].mxu0  ;;  %1855 = vmatmul.mubr.msk.f32.gmra.mrb[14].mxu0 %vm442_vm5, %v885_v53 }
 0x45b   :  { %1857 = vmatprep.mubr.msk.f32.mxu0 %vm2072_vm1, %v2071_v2 }
 0x45c   :  { %v886_v57 = vmax.f32 %v881_v55, 0.0 }
 0x45e   :  { %1858 = vmatmul.mubr.msk.f32.gmra.mrb[16].mxu0 %vm442_vm5, %v886_v57 }
 0x45f   :  { %1862 = vmatprep.mubr.msk.f32.mxu0 %vm2072_vm1, %v2071_v2 }
 0x462   :  { %1863 = vmatmul.mubr.msk.f32.vlgmr.msra.gmra.mrb[18].mxu0 %vm50_vm0, %v2141_v1  ;;  %v1568_v1 = vld [vmem:[%s2570_s9 + $0x1] ss:$0 sm:$0xff]  ;;  %s2077_s9 = smov [#allocation2]  }
 0x463   :  { %1865 = vmatprep.mubr.msk.f32.mxu0 %vm2072_vm1, %v2071_v2  ;;  %1872 = vmatpush3.msra.mxu0 %v1572_v58  ;;  %s1509_s13 = sshll.u32 %s2077_s9, 4  ;;  %s1510_s13 = int_to_ptr.vmem [resolvable:$true] %s1509_s13 }
 0x464   :  { %1981 = vmatprep.subr.bf16.mxu0 %v2073_v4  ;;  %s2047_s14 = scalar_lea.vmem %s1510_s13, 384  ;;  %p2052_p1 = scmp.lt.s32.totalorder %s1510_s13, %s1510_s13 }
 0x465   :  { %p2048_p0 = scmp.ne.s32.totalorder %s1510_s13, %s2047_s14  ;;  %p2053_p2 = scmp.lt.s32.totalorder %s2047_s14, %s2047_s14 }
 0x466   :  { %1866 = vmatmul.mubr.msk.f32.gmra.mrb[20].mxu0 %vm50_vm0, %v2158_v5 }
 0x467   :  { %1868 = vmatprep.mubr.msk.f32.mxu0 %vm2072_vm1, %v2071_v2  ;;  %p2054_p3 = por %p2053_p2, %p2052_p1 }
 0x469   :  { %p2055_p4 = pnand %p2054_p3, %p2048_p0 }
 0x46a   :  { %1869 = vmatmul.mubr.msk.f32.gmra.mrb[22].mxu0 %vm50_vm0, %v2182_v11  ;;  %v1584_v11 = vld [vmem:[%s2567_s6 + $0x40] sm:$0xff] }
 0x46b   :  { %1873 = vmatprep.mubr.msk.f32.mxu0 %vm2072_vm1, %v2071_v2 }
 0x46e   :  { %1874 = vmatmul.mubr.msk.f32.vlgmr.msra.gmra.mrb[18].mxu0 %vm50_vm0, %v2202_v15  ;;  %v1585_v15 = vld [vmem:[%s2567_s6 + $0x48] sm:$0xff] }
 0x46f   :  { %1876 = vmatprep.mubr.msk.f32.mxu0 %vm2072_vm1, %v2071_v2  ;;  %v1985_v60 = vpack.c.bf16 %v1585_v15, %v1584_v11  ;;  %v1460_v15 = vpop.permute.xlu0 %1459 }
 0x471   :  { %1986 = vmatpush3.bf16.msra.mxu1 %v1985_v60 }
 0x472   :  { %1877 = vmatmul.mubr.msk.f32.gmra.mrb[20].mxu0 %vm50_vm0, %v2214_v17  ;;  %v1586_v17 = vld [vmem:[%s2567_s6 + $0x50] sm:$0xff]  ;;  %1987 = vmatprep.subr.bf16.mxu1 %v2073_v4 }
 0x473   :  { %1879 = vmatprep.mubr.msk.f32.mxu0 %vm2072_vm1, %v2071_v2  ;;  %v1988_v63 = vpack.c.bf16 %v1587_v61, %v1586_v17  ;;  %v1462_v17 = vpop.permute.xlu0 %1461  ;;  %v1491_v61 = vsel %vm334_vm4, %v2187_v13, %v1460_v15 }
 0x475   :  { %1989 = vmatpush3.bf16.msra.mxu1 %v1988_v63 }
 0x476   :  { %1880 = vmatmul.mubr.msk.f32.gmra.mrb[22].mxu0 %vm50_vm0, %v2229_v19  ;;  %1990 = vmatprep.subr.bf16.mxu1 %v2073_v4 }
 0x477   :  { %1888 = vmatprep.mubr.msk.f32.mxu0 %vm2072_vm1, %v2071_v2 }
 0x529   :  { %v979_v5 = vpop.f32.mrb[12].mxu0 }
 0x52a   :  { %v980_v19 = vadd.f32 %v1568_v1, %v979_v5  ;;  %v1853_v59 = vpop.f32.mrb[13].mxu0 }
 0x52c   :  { %v993_v62 = vmax.f32 %v980_v19, 0.0  ;;  %v1464_v19 = vpop.permute.xlu1 %1463 }
 0x52d   :  { %v984_v0 = vpop.f32.mrb[14].mxu0  ;;  %v1493_v13 = vsel %vm334_vm4, %v2220_v18, %v1464_v19 }
 0x52e   :  { %v985_v3 = vadd.f32 %v1568_v1, %v984_v0  ;;  %1470 = vrot.lane.b32.xlu1 %v993_v62, %s2075_s19  ;;  %v1856_v6 = vpop.f32.mrb[15].mxu0 }
 0x52f   :  { %v1492_v6 = vsel %vm334_vm4, %v2192_v14, %v1462_v17 }
 0x530   :  { %v994_v7 = vmax.f32 %v985_v3, 0.0 }
 0x531   :  { %v989_v8 = vpop.f32.mrb[16].mxu0 }
 0x532   :  { %v1982_v9 = vpack.c.bf16 %v994_v7, %v993_v62  ;;  %v990_v10 = vadd.f32 %v1568_v1, %v989_v8  ;;  %1472 = vrot.lane.b32.xlu0 %v994_v7, %s2075_s19  ;;  %v1859_v12 = vpop.f32.mrb[17].mxu0 }
 0x534   :  { %v995_v16 = vmax.f32 %v990_v10, 0.0  ;;  %1983 = vmatpush3.bf16.msra.mxu0 %v1982_v9 }
 0x535   :  { %1886 = vmatprep.subr.mxu0 %v2071_v2 }
 0x536   :  { %1474 = vrot.lane.b32.xlu1 %v995_v16, %s2075_s19 }
 0x538   :  { %1887 = vmatpush3.msk.msra.mxu0 %vm239_vm2, %v995_v16 }
 0x539   :  { %1889 = vmatmul.mubr.msk.f32.vlgmr.msra.gmra.mrb[18].mxu0 %vm229_vm3, %v2241_v20  ;;  %v1594_v20 = vld [vmem:[%s2569_s8 + $0x88] sm:$0xff] }
 0x53a   :  { %1891 = vmatprep.mubr.msk.f32.mxu0 %vm2072_vm1, %v2071_v2  ;;  %v1991_v24 = vpack.c.bf16 %v1594_v20, %v1593_v23 }
 0x53d   :  { %1892 = vmatmul.mubr.msk.f32.gmra.mrb[20].mxu0 %vm229_vm3, %v2250_v21  ;;  %v1596_v21 = vld [vmem:[%s2569_s8 + $0x98] sm:$0xff] }
 0x53e   :  { %1894 = vmatprep.mubr.msk.f32.mxu0 %vm2072_vm1, %v2071_v2 }
 0x541   :  { %1895 = vmatmul.mubr.msk.f32.gmra.mrb[22].mxu0 %vm229_vm3, %v2259_v22  ;;  %v1994_v22 = vpack.c.bf16 %v1596_v21, %v1595_v25 }
 0x5a0   :  { %v1471_v59 = vpop.permute.xlu1 %1470 }
 0x5a1   :  { %v1494_v62 = vsel %vm442_vm5, %v1491_v61, %v1471_v59 }
 0x5a4   :  { %v1473_v60 = vpop.permute.xlu0 %1472 }
 0x5a5   :  { %v1495_v7 = vsel %vm442_vm5, %v1492_v6, %v1473_v60 }
 0x5a8   :  { %v1475_v63 = vpop.permute.xlu1 %1474 }
 0x5a9   :  { %v1496_v10 = vsel %vm442_vm5, %v1493_v13, %v1475_v63 }
 0x60c   :  { %v1229_v26 = vpop.f32.mrb[18].mxu0 }
 0x60d   :  { %v1890_v27 = vpop.f32.mrb[19].mxu0  ;;  %1906 = vmatmul.mubr.msk.f32.vlgmr.msra.gmra.mrb[18].mxu1 %vm334_vm4, %v1229_v26 }
 0x60e   :  { %1908 = vmatprep.mubr.msk.f32.mxu1 %vm2072_vm1, %v2071_v2  ;;  %1992 = vmatpush3.bf16.msra.mxu1 %v1991_v24 }
 0x60f   :  { %1993 = vmatprep.subr.bf16.mxu1 %v2073_v4 }
 0x610   :  { %v1234_v30 = vpop.f32.mrb[20].mxu0 }
 0x611   :  { %v1893_v31 = vpop.f32.mrb[21].mxu0  ;;  %1909 = vmatmul.mubr.msk.f32.gmra.mrb[20].mxu1 %vm334_vm4, %v1234_v30 }
 0x612   :  { %1911 = vmatprep.mubr.msk.f32.mxu1 %vm2072_vm1, %v2071_v2  ;;  %1995 = vmatpush3.bf16.msra.mxu1 %v1994_v22 }
 0x613   :  { %1996 = vmatprep.subr.bf16.mxu1 %v2073_v4 }
 0x614   :  { %v1239_v33 = vpop.f32.mrb[22].mxu0 }
 0x615   :  { %v1896_v34 = vpop.f32.mrb[23].mxu0  ;;  %1912 = vmatmul.mubr.msk.f32.gmra.mrb[22].mxu1 %vm334_vm4, %v1239_v33 }
 0x616   :  { %1998 = vmatpush3.bf16.msra.mxu1 %v1997_v32  ;;  %1930 = vmatprep.mubr.msk.f32.mxu1 %vm2072_vm1, %v2071_v2 }
 0x617   :  { %1999 = vmatprep.subr.bf16.mxu1 %v2073_v4 }
 0x61a   :  { %2001 = vmatpush3.bf16.msra.mxu1 %v2000_v37 }
 0x6e0   :  { %v1331_v39 = vpop.f32.mrb[18].mxu1 }
 0x6e1   :  { %v1332_v40 = vadd.f32 %v1589_v38, %v1331_v39  ;;  %v1907_v41 = vpop.f32.mrb[19].mxu1 }
 0x6e3   :  { %v1345_v42 = vmax.f32 %v1332_v40, 0.0 }
 0x6e4   :  { %v1336_v43 = vpop.f32.mrb[20].mxu1 }
 0x6e5   :  { %v1337_v4 = vadd.f32 %v1589_v38, %v1336_v43  ;;  %v1910_v44 = vpop.f32.mrb[21].mxu1  ;;  %1931 = vmatmul.mubr.msk.f32.vlgmr.msra.gmra.mrb[24].mxu1 %vm442_vm5, %v1345_v42 }
 0x6e6   :  { %1933 = vmatprep.mubr.msk.f32.mxu1 %vm2072_vm1, %v2071_v2 }
 0x6e7   :  { %v1346_v45 = vmax.f32 %v1337_v4, 0.0 }
 0x6e8   :  { %v1341_v46 = vpop.f32.mrb[22].mxu1 }
 0x6e9   :  { %v1342_v47 = vadd.f32 %v1589_v38, %v1341_v46  ;;  %v1913_v48 = vpop.f32.mrb[23].mxu1  ;;  %1934 = vmatmul.mubr.msk.f32.gmra.mrb[26].mxu1 %vm442_vm5, %v1346_v45 }
 0x6ea   :  { %1936 = vmatprep.mubr.msk.f32.mxu1 %vm2072_vm1, %v2071_v2 }
 0x6eb   :  { %v1347_v49 = vmax.f32 %v1342_v47, 0.0 }
 0x6ed   :  { %1937 = vmatmul.mubr.msk.f32.gmra.mrb[28].mxu1 %vm442_vm5, %v1347_v49 }
 0x7b8   :  { %v1440_v51 = vpop.f32.mrb[24].mxu1 }
 0x7b9   :  { %v1441_v52 = vadd.f32 %v1602_v50, %v1440_v51  ;;  %v1932_v53 = vpop.f32.mrb[25].mxu1 }
 0x7bb   :  { %v1454_v54 = vmax.f32 %v1441_v52, 0.0 }
 0x7bc   :  { %v1445_v55 = vpop.f32.mrb[26].mxu1 }
 0x7bd   :  { %v1446_v56 = vadd.f32 %v1602_v50, %v1445_v55  ;;  %1482 = vrot.lane.b32.xlu0 %v1454_v54, %s2076_s12  ;;  %v1935_v57 = vpop.f32.mrb[27].mxu1 }
 0x7bf   :  { %v1455_v58 = vmax.f32 %v1446_v56, 0.0 }
 0x7c0   :  { %v1450_v1 = vpop.f32.mrb[28].mxu1 }
 0x7c1   :  { %v1451_v5 = vadd.f32 %v1602_v50, %v1450_v1  ;;  %1484 = vrot.lane.b32.xlu1 %v1455_v58, %s2076_s12  ;;  %v1938_v2 = vpop.f32.mrb[29].mxu1 }
 0x7c3   :  { %v1456_v11 = vmax.f32 %v1451_v5, 0.0 }
 0x7c5   :  { %1486 = vrot.lane.b32.xlu0 %v1456_v11, %s2076_s12 }
 0x82f   :  { %v1483_v0 = vpop.permute.xlu0 %1482 }
 0x830   :  { %v1498_v3 = vsel %vm1497_vm6, %v1494_v62, %v1483_v0 }
 0x831   :  { %1501 = vst [vmem:[#allocation2] sm:$0xff] %v1498_v3 }
 0x833   :  { %v1485_v8 = vpop.permute.xlu1 %1484 }
 0x834   :  { %v1499_v9 = vsel %vm1497_vm6, %v1495_v7, %v1485_v8 }
 0x835   :  { %1502 = vst [vmem:[#allocation2 + $0x8] sm:$0xff] %v1499_v9 }
 0x837   :  { %v1487_v12 = vpop.permute.xlu0 %1486 }
 0x838   :  { %v1500_v16 = vsel %vm1497_vm6, %v1496_v10, %v1487_v12 }
 0x839   :  { %1503 = vst [vmem:[#allocation2 + $0x10] sm:$0x7f] %v1500_v16 }
 0x83a   :  { %2058 = shalt.err (!%p2055_p4)
}
 0x83b   :  { %s2059_s16 = scalar_lea.hbm %s2571_s10, 384 }
 0x83c   :  { %p2060_p5 = scmp.ne.s32.totalorder %s2571_s10, %s2059_s16  ;;  %p2063_p6 = scmp.lt.u32.totalorder %s2059_s16, %s2571_s10 }
 0x83e   :  { %p2065_p7 = pnand %p2063_p6, %p2060_p5 }
 0x840   :  { %2068 = shalt.err (!%p2065_p7)
}
 0x841   :  { %s2078_s20 = smov 128   ;;  %s2079_s21 = smov 8  }
 0x842   :  { %1515 = dma.vmem_to_hbm [thread:$0]  %s1510_s13, 384, %s2571_s10, [#allocation3], %s2078_s20, %s2078_s20, %s2079_s21  }
 0x843   :  { %2069 = dma.done.wait [#allocation3], 384  }
 0x844   :  { %2070 = vsyncadd [#allocation3], 4294966912 }
 0x845   :  { %1519 = vsyncpa [#allocation3], 1 }

</bundles_post_ra>
